<compile_context>
chip_gen: v6e
topology: v6e:2x2x1
jax: 0.10.0
libtpu: 0.0.40
codegen_flags: <defaults>
</compile_context>

<pallas_src>
import functools
import math

import jax
import jax.numpy as jnp
import numpy as np
from jax.experimental import pallas as pl
from jax.experimental.pallas import tpu as pltpu


def _round_up(v, n):
    return (v + n - 1) // n * n


def _arcface_kernel(x_ref, w_ref, lbl_ref, out_ref, wn_ref, *,
                    s, cos_m, sin_m, matmul_dtype):
    eps = 1e-12  # F.normalize default: v / max(||v||, eps)

    # Batch axis (grid axis 1) is innermost: normalize the resident weight
    # tile into scratch once per class tile instead of once per grid step.
    @pl.when(pl.program_id(1) == 0)
    def _():
        w = w_ref[...]                                                # (TC, D)
        inv_wn = 1.0 / jnp.maximum(
            jnp.sqrt(jnp.sum(w * w, axis=-1, keepdims=True)), eps)
        wn_ref[...] = (w * inv_wn).astype(wn_ref.dtype)

    x = x_ref[...]                                                    # (TB, D)
    inv_xn = 1.0 / jnp.maximum(
        jnp.sqrt(jnp.sum(x * x, axis=-1, keepdims=True)), eps)
    xn = (x * inv_xn).astype(matmul_dtype)

    # cosine = xn @ wn.T  (contract the feature axis on the MXU).
    cosine = jax.lax.dot_general(
        xn, wn_ref[...], (((1,), (1,)), ((), ())),
        preferred_element_type=jnp.float32)                           # (TB, TC)

    TB, TC = cosine.shape
    # Global class id of each column of this class tile.
    base = pl.program_id(0) * TC
    cls_ids = base + jax.lax.broadcasted_iota(jnp.int32, (TB, TC), 1)
    match = cls_ids == lbl_ref[...]                 # (TB, TC); <=1 True per row

    # Margin transform only on the label column:
    #   c_lbl = cosine at the label position (0 if the label is not in this
    #   class tile -- then `match` is all False and the value is never used).
    #   cos(acos(clamp(c)) + m) = clamp(c)*cos(m) - sqrt(1 - clamp(c)^2)*sin(m)
    c_lbl = jnp.sum(jnp.where(match, cosine, 0.0), axis=-1, keepdims=True)
    c_lbl = jnp.clip(c_lbl, -1.0, 1.0)
    sin_t = jnp.sqrt(jnp.maximum(1.0 - c_lbl * c_lbl, 0.0))
    target = c_lbl * cos_m - sin_t * sin_m                            # (TB, 1)

    out_ref[...] = (jnp.where(match, target, cosine) * s).astype(out_ref.dtype)


def _tile_footprint_bytes(tile_b, tile_c, D, mm_bytes):
    """Rough VMEM footprint: double-buffered x / weight / label / output tiles
    plus the normalized-weight scratch (single-buffered)."""
    return (4 * (2 * tile_b * D            # x tiles (f32, double-buffered)
                 + 2 * tile_c * D          # weight tiles
                 + 2 * tile_b * tile_c     # output tiles
                 + 2 * tile_b)             # label tiles
            + mm_bytes * tile_c * D)       # wn scratch


def arcface_forward(x, weight, label, *, s=30.0, m=0.5,
                    tile_b=128, tile_c=512, matmul_dtype=jnp.float32):
    """Pallas implementation of ArcFaceLoss.forward.

    x:      (B, in_features) float32
    weight: (out_features, in_features) float32
    label:  (B,) integer class ids
    returns (B, out_features) float32 logits.
    """
    x = x.astype(jnp.float32)
    weight = weight.astype(jnp.float32)
    B, D = x.shape
    C, Dw = weight.shape
    assert D == Dw, "feature dims must match"

    mm_bytes = jnp.dtype(matmul_dtype).itemsize

    # Clamp tiles to the (aligned) problem size; keep (8, 128) alignment so
    # output stores are lane-dense and sublane-aligned.
    tile_b = _round_up(max(8, min(tile_b, _round_up(B, 8))), 8)
    tile_c = _round_up(max(128, min(tile_c, _round_up(C, 128))), 128)

    # Shrink tiles if the footprint would blow a conservative VMEM budget
    # (keeps the kernel valid for very large in_features / requested tiles).
    budget = 40 * 1024 * 1024
    while tile_c > 128 and _tile_footprint_bytes(tile_b, tile_c, D, mm_bytes) > budget:
        tile_c -= 128
    while tile_b > 8 and _tile_footprint_bytes(tile_b, tile_c, D, mm_bytes) > budget:
        tile_b = max(8, _round_up(tile_b // 2, 8))

    Bp = _round_up(B, tile_b)
    Cp = _round_up(C, tile_c)

    if Bp != B:
        x = jnp.pad(x, ((0, Bp - B), (0, 0)))
    if Cp != C:
        weight = jnp.pad(weight, ((0, Cp - C), (0, 0)))
    lbl = jnp.pad(label.astype(jnp.int32).reshape(B, 1),
                  ((0, Bp - B), (0, 0)), constant_values=-1)

    kernel = functools.partial(
        _arcface_kernel, s=float(s), cos_m=math.cos(m), sin_m=math.sin(m),
        matmul_dtype=matmul_dtype)

    # Explicit VMEM budget from the tile footprint, with 2x slack for
    # intermediates; clamp to stay under v7x's 64 MiB per-core VMEM.
    est = _tile_footprint_bytes(tile_b, tile_c, D, mm_bytes)
    vmem_limit = int(min(max(2 * est, 16 * 1024 * 1024), 48 * 1024 * 1024))

    grid = (Cp // tile_c, Bp // tile_b)  # (class tiles, batch tiles)

    # Advisory cost hint for the XLA scheduler (matmul dominates; no
    # transcendentals since the margin uses the closed form).
    cost = pl.CostEstimate(
        flops=2 * Bp * Cp * D + 4 * (Bp * D + Cp * D) + 6 * Bp * Cp,
        transcendentals=0,
        bytes_accessed=4 * (Cp * D + grid[0] * Bp * D + Bp * Cp + Bp))

    out_full = pl.pallas_call(
        kernel,
        out_shape=jax.ShapeDtypeStruct((Bp, Cp), jnp.float32),
        grid_spec=pltpu.PrefetchScalarGridSpec(
            num_scalar_prefetch=0,
            grid=grid,
            in_specs=[
                pl.BlockSpec((tile_b, D), lambda j, i: (i, 0)),   # x
                pl.BlockSpec((tile_c, D), lambda j, i: (j, 0)),   # weight
                pl.BlockSpec((tile_b, 1), lambda j, i: (i, 0)),   # label
            ],
            out_specs=pl.BlockSpec((tile_b, tile_c), lambda j, i: (i, j)),
            scratch_shapes=[pltpu.VMEM((tile_c, D), matmul_dtype)],
        ),
        compiler_params=pltpu.CompilerParams(
            dimension_semantics=("parallel", "arbitrary"),
            vmem_limit_bytes=vmem_limit,
        ),
        cost_estimate=cost,
    )(x, weight, lbl)

    if Bp != B or Cp != C:
        out_full = out_full[:B, :C]
    return out_full


def _reference(x, weight, label, *, s=30.0, m=0.5):
    """Pure-JAX reference mirroring the PyTorch module."""
    eps = 1e-12
    xn = x / jnp.maximum(jnp.linalg.norm(x, axis=1, keepdims=True), eps)
    wn = weight / jnp.maximum(jnp.linalg.norm(weight, axis=1, keepdims=True), eps)
    cosine = xn @ wn.T
    theta = jnp.arccos(jnp.clip(cosine, -1.0, 1.0))
    target_logit = jnp.cos(theta + m)
    one_hot = jax.nn.one_hot(label, weight.shape[0], dtype=cosine.dtype)
    return (one_hot * target_logit + (1.0 - one_hot) * cosine) * s


if __name__ == "__main__":
    def run_case(B, D, C, s, m, tile_b, tile_c, key):
        k_x, k_w, k_l = jax.random.split(key, 3)
        x = jax.random.normal(k_x, (B, D), dtype=jnp.float32)
        # Deterministic xavier_uniform_-style init for weight:
        bound = math.sqrt(6.0 / (D + C))
        w = jax.random.uniform(k_w, (C, D), dtype=jnp.float32,
                               minval=-bound, maxval=bound)
        lbl = jax.random.randint(k_l, (B,), 0, C, dtype=jnp.int32)

        out = jax.block_until_ready(
            arcface_forward(x, w, lbl, s=s, m=m, tile_b=tile_b, tile_c=tile_c))
        ref = jax.block_until_ready(_reference(x, w, lbl, s=s, m=m))

        assert out.shape == (B, C) and out.dtype == jnp.float32
        np.testing.assert_allclose(np.asarray(out), np.asarray(ref),
                                   rtol=1e-5, atol=1e-5)

    # Small shapes consistent with the module: batch=8, in_features=32, classes=16.
    run_case(8, 32, 16, 30.0, 0.5, 128, 512, jax.random.PRNGKey(0))
    # Multi-tile case exercising the (class, batch) grid, class/batch padding
    # and the global class-id offset in the one-hot match.
    run_case(16, 32, 300, 30.0, 0.5, 8, 128, jax.random.PRNGKey(1))
    # Lane-aligned feature dim + multiple class tiles (lane-dense stores,
    # per-class-tile weight normalization reuse).
    run_case(32, 128, 640, 64.0, 0.35, 16, 256, jax.random.PRNGKey(2))

    print("KERNEL_OK")
</pallas_src>

<mosaic_0001>
module attributes {stable_mosaic.version = 11 : i64} {
  func.func @_arcface_kernel(%arg0: i32, %arg1: i32, %arg2: memref<8x32xf32, #tpu.memory_space<vmem>>, %arg3: memref<128x32xf32, #tpu.memory_space<vmem>>, %arg4: memref<8x1xi32, #tpu.memory_space<vmem>>, %arg5: memref<8x128xf32, #tpu.memory_space<vmem>>, %arg6: memref<128x32xf32, #tpu.memory_space<vmem>>) attributes {dimension_semantics = [#tpu.dimension_semantics<parallel>, #tpu.dimension_semantics<arbitrary>], iteration_bounds = array<i64: 1, 1>, scalar_prefetch = 0 : i64, scratch_operands = 1 : i64, tpu.core_type = #tpu.core_type<tc>, window_params = [{transform_indices = @transform_0, window_bounds = array<i64: 8, 32>}, {transform_indices = @transform_1, window_bounds = array<i64: 128, 32>}, {transform_indices = @transform_2, window_bounds = array<i64: 8, 1>}, {transform_indices = @transform_3, window_bounds = array<i64: 8, 128>}]} {
    %c0_i32 = arith.constant 0 : i32
    %0 = arith.cmpi eq, %arg1, %c0_i32 : i32
    %1 = arith.extui %0 : i1 to i32
    %c0_i32_0 = arith.constant 0 : i32
    %2 = arith.cmpi ne, %1, %c0_i32_0 : i32
    scf.if %2 {
      %c0_20 = arith.constant 0 : index
      %c0_21 = arith.constant 0 : index
      %48 = vector.load %arg3[%c0_20, %c0_21] : memref<128x32xf32, #tpu.memory_space<vmem>>, vector<128x32xf32>
      %49 = arith.mulf %48, %48 : vector<128x32xf32>
      %cst_22 = arith.constant dense<0.000000e+00> : vector<128xf32>
      %50 = vector.multi_reduction <add>, %49, %cst_22 [1] : vector<128x32xf32> to vector<128xf32>
      %51 = vector.shape_cast %50 : vector<128xf32> to vector<128x1xf32>
      %52 = math.sqrt %51 : vector<128x1xf32>
      %cst_23 = arith.constant 9.99999996E-13 : f32
      %53 = vector.broadcast %cst_23 : f32 to vector<128x1xf32>
      %54 = arith.maximumf %52, %53 : vector<128x1xf32>
      %cst_24 = arith.constant 1.000000e+00 : f32
      %55 = vector.broadcast %cst_24 : f32 to vector<128x1xf32>
      %56 = arith.divf %55, %54 : vector<128x1xf32>
      %57 = vector.broadcast %56 : vector<128x1xf32> to vector<128x32xf32>
      %58 = arith.mulf %48, %57 : vector<128x32xf32>
      %c0_25 = arith.constant 0 : index
      %c0_26 = arith.constant 0 : index
      %59 = vector.load %arg6[%c0_25, %c0_26] : memref<128x32xf32, #tpu.memory_space<vmem>>, vector<128x32xf32>
      tpu.vector_store %arg6[%c0_25, %c0_26], %58 {strides = array<i32>} : memref<128x32xf32, #tpu.memory_space<vmem>>, vector<128x32xf32>,
    } else {
    }
    %c0 = arith.constant 0 : index
    %c0_1 = arith.constant 0 : index
    %3 = vector.load %arg2[%c0, %c0_1] : memref<8x32xf32, #tpu.memory_space<vmem>>, vector<8x32xf32>
    %4 = arith.mulf %3, %3 : vector<8x32xf32>
    %cst = arith.constant dense<0.000000e+00> : vector<8xf32>
    %5 = vector.multi_reduction <add>, %4, %cst [1] : vector<8x32xf32> to vector<8xf32>
    %6 = vector.shape_cast %5 : vector<8xf32> to vector<8x1xf32>
    %7 = math.sqrt %6 : vector<8x1xf32>
    %cst_2 = arith.constant 9.99999996E-13 : f32
    %8 = vector.broadcast %cst_2 : f32 to vector<8x1xf32>
    %9 = arith.maximumf %7, %8 : vector<8x1xf32>
    %cst_3 = arith.constant 1.000000e+00 : f32
    %10 = vector.broadcast %cst_3 : f32 to vector<8x1xf32>
    %11 = arith.divf %10, %9 : vector<8x1xf32>
    %12 = vector.broadcast %11 : vector<8x1xf32> to vector<8x32xf32>
    %13 = arith.mulf %3, %12 : vector<8x32xf32>
    %c0_4 = arith.constant 0 : index
    %c0_5 = arith.constant 0 : index
    %14 = vector.load %arg6[%c0_4, %c0_5] : memref<128x32xf32, #tpu.memory_space<vmem>>, vector<128x32xf32>
    %cst_6 = arith.constant dense<0.000000e+00> : vector<8x128xf32>
    %15 = tpu.matmul %13, %14, %cst_6 {dimension_numbers = #tpu.dot_dimension_numbers<[1], [1], [0], [0], [0, 0, 1, 0], [], []>} : vector<8x32xf32>, vector<128x32xf32>, vector<8x128xf32> -> vector<8x128xf32>
    %c128_i32 = arith.constant 128 : i32
    %16 = arith.muli %arg0, %c128_i32 : i32
    %17 = tpu.iota {dimensions = array<i32: 1>} : vector<8x128xi32>
    %18 = vector.broadcast %16 : i32 to vector<8x128xi32>
    %19 = arith.addi %18, %17 : vector<8x128xi32>
    %c0_7 = arith.constant 0 : index
    %c0_8 = arith.constant 0 : index
    %20 = vector.load %arg4[%c0_7, %c0_8] : memref<8x1xi32, #tpu.memory_space<vmem>>, vector<8x1xi32>
    %21 = vector.broadcast %20 : vector<8x1xi32> to vector<8x128xi32>
    %22 = arith.cmpi eq, %19, %21 : vector<8x128xi32>
    %cst_9 = arith.constant 0.000000e+00 : f32
    %23 = vector.broadcast %cst_9 : f32 to vector<8x128xf32>
    %24 = arith.select %22, %15, %23 : vector<8x128xi1>, vector<8x128xf32>
    %cst_10 = arith.constant dense<0.000000e+00> : vector<8xf32>
    %25 = vector.multi_reduction <add>, %24, %cst_10 [1] : vector<8x128xf32> to vector<8xf32>
    %26 = vector.shape_cast %25 : vector<8xf32> to vector<8x1xf32>
    %cst_11 = arith.constant -1.000000e+00 : f32
    %cst_12 = arith.constant 1.000000e+00 : f32
    %27 = vector.broadcast %cst_11 : f32 to vector<8x1xf32>
    %28 = arith.maximumf %27, %26 : vector<8x1xf32>
    %29 = vector.broadcast %cst_12 : f32 to vector<8x1xf32>
    %30 = arith.minimumf %29, %28 : vector<8x1xf32>
    %31 = arith.mulf %30, %30 : vector<8x1xf32>
    %cst_13 = arith.constant 1.000000e+00 : f32
    %32 = vector.broadcast %cst_13 : f32 to vector<8x1xf32>
    %33 = arith.subf %32, %31 : vector<8x1xf32>
    %cst_14 = arith.constant 0.000000e+00 : f32
    %34 = vector.broadcast %cst_14 : f32 to vector<8x1xf32>
    %35 = arith.maximumf %33, %34 : vector<8x1xf32>
    %36 = math.sqrt %35 : vector<8x1xf32>
    %cst_15 = arith.constant 0.87758255 : f32
    %37 = vector.broadcast %cst_15 : f32 to vector<8x1xf32>
    %38 = arith.mulf %30, %37 : vector<8x1xf32>
    %cst_16 = arith.constant 0.47942555 : f32
    %39 = vector.broadcast %cst_16 : f32 to vector<8x1xf32>
    %40 = arith.mulf %36, %39 : vector<8x1xf32>
    %41 = arith.subf %38, %40 : vector<8x1xf32>
    %42 = vector.shape_cast %41 : vector<8x1xf32> to vector<8x1xf32>
    %43 = vector.broadcast %42 : vector<8x1xf32> to vector<8x128xf32>
    %44 = arith.select %22, %43, %15 : vector<8x128xi1>, vector<8x128xf32>
    %cst_17 = arith.constant 3.000000e+01 : f32
    %45 = vector.broadcast %cst_17 : f32 to vector<8x128xf32>
    %46 = arith.mulf %44, %45 : vector<8x128xf32>
    %c0_18 = arith.constant 0 : index
    %c0_19 = arith.constant 0 : index
    %47 = vector.load %arg5[%c0_18, %c0_19] : memref<8x128xf32, #tpu.memory_space<vmem>>, vector<8x128xf32>
    tpu.vector_store %arg5[%c0_18, %c0_19], %46 {strides = array<i32>} : memref<8x128xf32, #tpu.memory_space<vmem>>, vector<8x128xf32>,
    return
  }
  func.func @transform_0(%arg0: i32, %arg1: i32) -> (i32, i32) {
    %c0_i32 = arith.constant 0 : i32
    %c0_i32_0 = arith.constant 0 : i32
    return %arg1, %c0_i32 : i32, i32
  }
  func.func @transform_1(%arg0: i32, %arg1: i32) -> (i32, i32) {
    %c0_i32 = arith.constant 0 : i32
    %c0_i32_0 = arith.constant 0 : i32
    return %arg0, %c0_i32 : i32, i32
  }
  func.func @transform_2(%arg0: i32, %arg1: i32) -> (i32, i32) {
    %c0_i32 = arith.constant 0 : i32
    %c0_i32_0 = arith.constant 0 : i32
    return %arg1, %c0_i32 : i32, i32
  }
  func.func @transform_3(%arg0: i32, %arg1: i32) -> (i32, i32) {
    %c0_i32 = arith.constant 0 : i32
    return %arg1, %arg0 : i32, i32
  }
}

</mosaic_0001>

<bundles_post_ra>
// kernel: tpu_custom_call.1
= control target key start
LH: loop header
LB: loop body
LE: loop exit
PB: predicated region body
PF: predicated region fallthrough
CT: control target
= control target key end

     0   :  { %vm51_vm0 = vcmask 261120   ;;  %s1034_s0 = inlined_call_operand.vmem [shape: f32[8,32], index: 0, kind: input, shape index: {}]   ;;  %s1035_s1 = inlined_call_operand.vmem [shape: f32[128,32], index: 1, kind: input, shape index: {}]   ;;  %s1036_s2 = inlined_call_operand.vmem [shape: s32[8,1], index: 2, kind: input, shape index: {}]   ;;  %s1037_s3 = inlined_call_operand.hbm [shape: f32[8,128], index: 3, kind: output, shape index: {}]  }
   0x1   :  { %v686_v0 = vld [vmem:[%s1035_s1 + $0x78] sm:$0xff]  ;;  %v691_v1 = vld [vmem:[%s1035_s1 + $0x68] sm:$0xff]  ;;  %v696_v2 = vld [vmem:[%s1035_s1 + $0x70] sm:$0xff] }
   0x2   :  { %v50_v3 = vmul.f32 %v686_v0, %v686_v0  ;;  %v48_v4 = vmul.f32 %v691_v1, %v691_v1  ;;  %v49_v5 = vmul.f32 %v696_v2, %v696_v2  ;;  %v707_v6 = vld [vmem:[%s1035_s1 + $0x60] sm:$0xff]  ;;  %v714_v8 = vld [vmem:[%s1035_s1 + $0x58] sm:$0xff]  ;;  %v719_v9 = vld [vmem:[%s1035_s1 + $0x50] sm:$0xff] }
   0x3   :  { %v47_v7 = vmul.f32 %v707_v6, %v707_v6  ;;  %v46_v14 = vmul.f32 %v714_v8, %v714_v8  ;;  %v45_v15 = vmul.f32 %v719_v9, %v719_v9 }
   0x4   :  { %v97_v10 = vsel %vm51_vm0, %v50_v3, 0.0  ;;  %v91_v11 = vsel %vm51_vm0, %v48_v4, 0.0  ;;  %v94_v12 = vsel %vm51_vm0, %v49_v5, 0.0 }
   0x5   :  { %98 = vadd.xlane.f32.xlu0 %v97_v10  ;;  %92 = vadd.xlane.f32.xlu1 %v91_v11  ;;  %v88_v13 = vsel %vm51_vm0, %v47_v7, 0.0 }
   0x6   :  { %8 = vsyncpa [#allocation4], 0  ;;  %v732_v16 = vld [vmem:[%s1035_s1 + $0x48] sm:$0xff]  ;;  %v737_v17 = vld [vmem:[%s1035_s1 + $0x40] sm:$0xff]  ;;  %v85_v18 = vsel %vm51_vm0, %v46_v14, 0.0  ;;  %v82_v19 = vsel %vm51_vm0, %v45_v15, 0.0 }
   0x7   :  { %v44_v20 = vmul.f32 %v732_v16, %v732_v16  ;;  %v43_v21 = vmul.f32 %v737_v17, %v737_v17  ;;  %v748_v22 = vld [vmem:[%s1035_s1 + $0x38] sm:$0xff]  ;;  %v753_v23 = vld [vmem:[%s1035_s1 + $0x30] sm:$0xff]  ;;  %v764_v28 = vld [vmem:[%s1035_s1 + $0x28] sm:$0xff]  ;;  %v659_v51 = vmov 0.0   ;;  %vm660_vm1 = vmmov 0  }
   0x8   :  { %v42_v26 = vmul.f32 %v748_v22, %v748_v22  ;;  %v41_v27 = vmul.f32 %v753_v23, %v753_v23  ;;  %v769_v29 = vld [vmem:[%s1035_s1 + $0x20] sm:$0xff]  ;;  %v40_v32 = vmul.f32 %v764_v28, %v764_v28  ;;  %v780_v34 = vld [vmem:[%s1035_s1 + $0x18] sm:$0xff]  ;;  %v785_v35 = vld [vmem:[%s1035_s1 + $0x10] sm:$0xff]  ;;  %526 = vmatprep.subr.mxu0 %v659_v51  ;;  %558 = vmatprep.mubr.msk.f32.mxu0 %vm660_vm1, %v659_v51  ;;  %v661_v53 = vmov 0  }
   0x9   :  { %95 = vadd.xlane.f32.xlu0 %v94_v12  ;;  %89 = vadd.xlane.f32.xlu1 %v88_v13  ;;  %v79_v24 = vsel %vm51_vm0, %v44_v20, 0.0  ;;  %v76_v25 = vsel %vm51_vm0, %v43_v21, 0.0  ;;  %v39_v33 = vmul.f32 %v769_v29, %v769_v29  ;;  %v38_v38 = vmul.f32 %v780_v34, %v780_v34  ;;  %v796_v40 = vld [vmem:[%s1035_s1 + $0x8] sm:$0xff]  ;;  %v801_v41 = vld [vmem:[%s1035_s1] sm:$0xff] }
   0xa   :  { %v73_v30 = vsel %vm51_vm0, %v42_v26, 0.0  ;;  %v70_v31 = vsel %vm51_vm0, %v41_v27, 0.0  ;;  %v67_v36 = vsel %vm51_vm0, %v40_v32, 0.0  ;;  %v37_v39 = vmul.f32 %v785_v35, %v785_v35  ;;  %v812_v46 = vld [vmem:[%s1034_s0] sm:$0xff]  ;;  %565 = vset.pattern.permute.xlu1 %v661_v53  ;;  %566 = vset.pattern.permute.xlu0 %v661_v53 }
   0xb   :  { %v64_v37 = vsel %vm51_vm0, %v39_v33, 0.0  ;;  %v61_v42 = vsel %vm51_vm0, %v38_v38, 0.0  ;;  %v36_v44 = vmul.f32 %v796_v40, %v796_v40  ;;  %v35_v45 = vmul.f32 %v801_v41, %v801_v41  ;;  %v451_v52 = vld [vmem:[%s1036_s2] sm:$0xff]  ;;  %s662_s2 = smov [#allocation3]  }
   0xc   :  { %v58_v43 = vsel %vm51_vm0, %v37_v39, 0.0  ;;  %v293_v49 = vmul.f32 %v812_v46, %v812_v46  ;;  %s483_s19 = sshll.u32 %s662_s2, 4  ;;  %s484_s19 = int_to_ptr.vmem [resolvable:$true] %s483_s19 }
   0xd   :  { %86 = vadd.xlane.f32.xlu0 %v85_v18  ;;  %83 = vadd.xlane.f32.xlu1 %v82_v19  ;;  %v55_v47 = vsel %vm51_vm0, %v36_v44, 0.0  ;;  %v52_v48 = vsel %vm51_vm0, %v35_v45, 0.0  ;;  %s637_s20 = scalar_lea.vmem %s484_s19, 128  ;;  %p642_p1 = scmp.lt.s32.totalorder %s484_s19, %s484_s19 }
   0xe   :  { %v295_v50 = vsel %vm51_vm0, %v293_v49, 0.0  ;;  %p638_p0 = scmp.ne.s32.totalorder %s484_s19, %s637_s20  ;;  %p643_p2 = scmp.lt.s32.totalorder %s637_s20, %s637_s20 }
  0x10   :  { %p644_p3 = por %p643_p2, %p642_p1 }
  0x11   :  { %80 = vadd.xlane.f32.xlu0 %v79_v24  ;;  %77 = vadd.xlane.f32.xlu1 %v76_v25 }
  0x12   :  { %p645_p4 = pnand %p644_p3, %p638_p0 }
  0x15   :  { %74 = vadd.xlane.f32.xlu0 %v73_v30  ;;  %71 = vadd.xlane.f32.xlu1 %v70_v31 }
  0x19   :  { %68 = vadd.xlane.f32.xlu0 %v67_v36  ;;  %65 = vadd.xlane.f32.xlu1 %v64_v37 }
  0x1d   :  { %62 = vadd.xlane.f32.xlu0 %v61_v42  ;;  %59 = vadd.xlane.f32.xlu1 %v58_v43 }
  0x21   :  { %56 = vadd.xlane.f32.xlu0 %v55_v47  ;;  %53 = vadd.xlane.f32.xlu1 %v52_v48 }
  0x25   :  { %296 = vadd.xlane.f32.xlu0 %v295_v50 }
  0x32   :  { %453 = vperm.xlu1 %565, %v451_v52  }
  0x8e   :  { %v99_v54 = vpop.xlane.xlu0 %98  ;;  %v93_v55 = vpop.xlane.xlu1 %92 }
  0x8f   :  { %567 = vrsqrt.f32 %v99_v54  ;;  %vm207_vm2 = vcmp.eq.f32.partialorder %v99_v54, inf  ;;  %vm209_vm3 = vcmp.eq.f32.partialorder %v99_v54, 0.0  ;;  %v210_v63 = vand.u32 2147483648, %v99_v54 }
  0x90   :  { %569 = vrsqrt.f32 %v93_v55  ;;  %vm193_vm4 = vcmp.eq.f32.partialorder %v93_v55, inf  ;;  %vm195_vm5 = vcmp.eq.f32.partialorder %v93_v55, 0.0  ;;  %v196_v5 = vand.u32 2147483648, %v93_v55 }
  0x92   :  { %v96_v56 = vpop.xlane.xlu0 %95  ;;  %v90_v57 = vpop.xlane.xlu1 %89 }
  0x93   :  { %571 = vrsqrt.f32 %v96_v56  ;;  %vm200_vm6 = vcmp.eq.f32.partialorder %v96_v56, inf  ;;  %vm202_vm7 = vcmp.eq.f32.partialorder %v96_v56, 0.0  ;;  %v203_v10 = vand.u32 2147483648, %v96_v56 }
  0x94   :  { %573 = vrsqrt.f32 %v90_v57  ;;  %vm186_vm8 = vcmp.eq.f32.partialorder %v90_v57, inf  ;;  %vm188_vm9 = vcmp.eq.f32.partialorder %v90_v57, 0.0  ;;  %v189_v14 = vand.u32 2147483648, %v90_v57 }
  0x96   :  { %v824_v58 = vpop.xlane.xlu0 %86  ;;  %v826_v59 = vpop.xlane.xlu1 %83 }
  0x97   :  { %575 = vrsqrt.f32 %v824_v58  ;;  %vm179_vm10 = vcmp.eq.f32.partialorder %v824_v58, inf  ;;  %vm181_vm11 = vcmp.eq.f32.partialorder %v824_v58, 0.0  ;;  %v182_v26 = vand.u32 2147483648, %v824_v58 }
  0x98   :  { %577 = vrsqrt.f32 %v826_v59  ;;  %vm172_vm12 = vcmp.eq.f32.partialorder %v826_v59, inf  ;;  %vm174_vm13 = vcmp.eq.f32.partialorder %v826_v59, 0.0  ;;  %v175_v33 = vand.u32 2147483648, %v826_v59 }
  0x9a   :  { %v830_v60 = vpop.xlane.xlu0 %80  ;;  %v832_v61 = vpop.xlane.xlu1 %77 }
  0x9b   :  { %579 = vrsqrt.f32 %v830_v60  ;;  %vm165_vm14 = vcmp.eq.f32.partialorder %v830_v60, inf  ;;  %vm167_vm15 = vcmp.eq.f32.partialorder %v830_v60, 0.0  ;;  %v168_v49 = vand.u32 2147483648, %v830_v60 }
  0x9c   :  { %v568_v62 = vpop.eup %567  ;;  %581 = vrsqrt.f32 %v832_v61  ;;  %vm158_vm1 = vcmp.eq.f32.partialorder %v832_v61, inf }
  0x9d   :  { %v570_v3 = vpop.eup %569  ;;  %v206_v4 = vmul.f32 %v568_v62, %v99_v54 }
  0x9e   :  { %v192_v7 = vmul.f32 %v570_v3, %v93_v55  ;;  %v836_v11 = vpop.xlane.xlu0 %74  ;;  %v838_v12 = vpop.xlane.xlu1 %71 }
  0x9f   :  { %v208_v13 = vsel %vm207_vm2, %v99_v54, %v206_v4  ;;  %583 = vrsqrt.f32 %v836_v11  ;;  %vm160_vm2 = vcmp.eq.f32.partialorder %v832_v61, 0.0 }
  0xa0   :  { %v572_v15 = vpop.eup %571  ;;  %v211_v18 = vsel %vm209_vm3, %v210_v63, %v208_v13  ;;  %v194_v19 = vsel %vm193_vm4, %v93_v55, %v192_v7  ;;  %585 = vrsqrt.f32 %v838_v12  ;;  %vm151_vm3 = vcmp.eq.f32.partialorder %v836_v11, inf }
  0xa1   :  { %v574_v20 = vpop.eup %573  ;;  %v227_v21 = vmax.f32 %v211_v18, 1e-12  ;;  %v197_v24 = vsel %vm195_vm5, %v196_v5, %v194_v19  ;;  %v199_v25 = vmul.f32 %v572_v15, %v96_v56  ;;  %vm153_vm4 = vcmp.eq.f32.partialorder %v836_v11, 0.0 }
  0xa2   :  { %v225_v27 = vmax.f32 %v197_v24, 1e-12  ;;  %v185_v30 = vmul.f32 %v574_v20, %v90_v57  ;;  %v851_v31 = vpop.xlane.xlu0 %68  ;;  %v856_v36 = vpop.xlane.xlu1 %65  ;;  %vm144_vm5 = vcmp.eq.f32.partialorder %v838_v12, inf  ;;  %v147_v18 = vand.u32 2147483648, %v838_v12 }
  0xa3   :  { %587 = vrcp.f32 %v227_v21  ;;  %v201_v32 = vsel %vm200_vm6, %v96_v56, %v199_v25  ;;  %v161_v56 = vand.u32 2147483648, %v832_v61  ;;  %vm146_vm6 = vcmp.eq.f32.partialorder %v838_v12, 0.0 }
  0xa4   :  { %v576_v37 = vpop.eup %575  ;;  %589 = vrcp.f32 %v225_v27  ;;  %v204_v38 = vsel %vm202_vm7, %v203_v10, %v201_v32  ;;  %v187_v39 = vsel %vm186_vm8, %v90_v57, %v185_v30  ;;  %vm137_vm7 = vcmp.eq.f32.partialorder %v851_v31, inf }
  0xa5   :  { %v578_v42 = vpop.eup %577  ;;  %v226_v43 = vmax.f32 %v204_v38, 1e-12  ;;  %v190_v44 = vsel %vm188_vm9, %v189_v14, %v187_v39  ;;  %v178_v45 = vmul.f32 %v576_v37, %v824_v58  ;;  %591 = vrsqrt.f32 %v851_v31 }
  0xa6   :  { %v224_v47 = vmax.f32 %v190_v44, 1e-12  ;;  %v171_v48 = vmul.f32 %v578_v42, %v826_v59  ;;  %593 = vrsqrt.f32 %v856_v36  ;;  %v867_v50 = vpop.xlane.xlu0 %62  ;;  %vm139_vm8 = vcmp.eq.f32.partialorder %v851_v31, 0.0 }
  0xa7   :  { %595 = vrcp.f32 %v226_v43  ;;  %v180_v52 = vsel %vm179_vm10, %v824_v58, %v178_v45  ;;  %v887_v58 = vpop.xlane.xlu1 %59  ;;  %vm130_vm9 = vcmp.eq.f32.partialorder %v856_v36, inf  ;;  %vm132_vm10 = vcmp.eq.f32.partialorder %v856_v36, 0.0 }
  0xa8   :  { %v580_v53 = vpop.eup %579  ;;  %597 = vrcp.f32 %v224_v47  ;;  %v183_v54 = vsel %vm181_vm11, %v182_v26, %v180_v52  ;;  %v173_v55 = vsel %vm172_vm12, %v826_v59, %v171_v48  ;;  %v154_v59 = vand.u32 2147483648, %v836_v11 }
  0xa9   :  { %v582_v57 = vpop.eup %581  ;;  %v223_v62 = vmax.f32 %v183_v54, 1e-12  ;;  %v176_v63 = vsel %vm174_vm13, %v175_v33, %v173_v55  ;;  %v164_v3 = vmul.f32 %v580_v53, %v830_v60  ;;  %599 = vrsqrt.f32 %v867_v50 }
  0xaa   :  { %v222_v4 = vmax.f32 %v176_v63, 1e-12  ;;  %v157_v5 = vmul.f32 %v582_v57, %v832_v61  ;;  %v894_v10 = vpop.xlane.xlu0 %56  ;;  %vm123_vm11 = vcmp.eq.f32.partialorder %v867_v50, inf  ;;  %v126_v57 = vand.u32 2147483648, %v867_v50 }
  0xab   :  { %601 = vrcp.f32 %v223_v62  ;;  %v166_v7 = vsel %vm165_vm14, %v830_v60, %v164_v3  ;;  %v909_v60 = vpop.xlane.xlu1 %53  ;;  %vm125_vm12 = vcmp.eq.f32.partialorder %v867_v50, 0.0  ;;  %vm116_vm13 = vcmp.eq.f32.partialorder %v887_v58, inf }
  0xac   :  { %v584_v13 = vpop.eup %583  ;;  %603 = vrcp.f32 %v222_v4  ;;  %v169_v14 = vsel %vm167_vm15, %v168_v49, %v166_v7  ;;  %v159_v15 = vsel %vm158_vm1, %v832_v61, %v157_v5  ;;  %vm118_vm14 = vcmp.eq.f32.partialorder %v887_v58, 0.0 }
  0xad   :  { %v586_v19 = vpop.eup %585  ;;  %v221_v20 = vmax.f32 %v169_v14, 1e-12  ;;  %v162_v21 = vsel %vm160_vm2, %v161_v56, %v159_v15  ;;  %v150_v24 = vmul.f32 %v584_v13, %v836_v11  ;;  %605 = vrsqrt.f32 %v887_v58 }
  0xae   :  { %v220_v25 = vmax.f32 %v162_v21, 1e-12  ;;  %v143_v26 = vmul.f32 %v586_v19, %v838_v12  ;;  %607 = vrsqrt.f32 %v894_v10  ;;  %v119_v13 = vand.u32 2147483648, %v887_v58 }
  0xaf   :  { %609 = vrcp.f32 %v221_v20  ;;  %v152_v27 = vsel %vm151_vm3, %v836_v11, %v150_v24  ;;  %v140_v11 = vand.u32 2147483648, %v851_v31  ;;  %vm109_vm15 = vcmp.eq.f32.partialorder %v894_v10, inf }
  0xb0   :  { %v588_v61 = vpop.eup %587  ;;  %611 = vrcp.f32 %v220_v25  ;;  %v155_v30 = vsel %vm153_vm4, %v154_v59, %v152_v27  ;;  %v145_v32 = vsel %vm144_vm5, %v838_v12, %v143_v26  ;;  %vm111_vm1 = vcmp.eq.f32.partialorder %v894_v10, 0.0 }
  0xb1   :  { %v590_v33 = vpop.eup %589  ;;  %v275_v37 = vmul.f32 %v588_v61, %v686_v0  ;;  %v219_v38 = vmax.f32 %v155_v30, 1e-12  ;;  %v148_v39 = vsel %vm146_vm6, %v147_v18, %v145_v32  ;;  %613 = vrsqrt.f32 %v909_v60 }
  0xb2   :  { %v592_v42 = vpop.eup %591  ;;  %v273_v43 = vmul.f32 %v590_v33, %v691_v1  ;;  %v218_v44 = vmax.f32 %v148_v39, 1e-12  ;;  %v133_v0 = vand.u32 2147483648, %v856_v36  ;;  %vm102_vm2 = vcmp.eq.f32.partialorder %v909_v60, inf }
  0xb3   :  { %v594_v45 = vpop.eup %593  ;;  %291 = vst.msk [vmem:[#allocation2 + $0x78] sm:$0xff] %vm51_vm0, %v275_v37  ;;  %615 = vrcp.f32 %v219_v38  ;;  %v136_v12 = vmul.f32 %v592_v42, %v851_v31  ;;  %v105_v30 = vand.u32 2147483648, %v909_v60  ;;  %vm104_vm3 = vcmp.eq.f32.partialorder %v909_v60, 0.0 }
  0xb4   :  { %v596_v47 = vpop.eup %595  ;;  %289 = vst.msk [vmem:[#allocation2 + $0x68] sm:$0xff] %vm51_vm0, %v273_v43  ;;  %617 = vrcp.f32 %v218_v44  ;;  %v129_v1 = vmul.f32 %v594_v45, %v856_v36 }
  0xb5   :  { %v598_v48 = vpop.eup %597  ;;  %v274_v49 = vmul.f32 %v596_v47, %v696_v2  ;;  %v138_v52 = vsel %vm137_vm7, %v851_v31, %v136_v12 }
  0xb6   :  { %v600_v53 = vpop.eup %599  ;;  %v272_v54 = vmul.f32 %v598_v48, %v707_v6  ;;  %v141_v55 = vsel %vm139_vm8, %v140_v11, %v138_v52  ;;  %v131_v56 = vsel %vm130_vm9, %v856_v36, %v129_v1 }
  0xb7   :  { %290 = vst.msk [vmem:[#allocation2 + $0x70] sm:$0xff] %vm51_vm0, %v274_v49  ;;  %v217_v62 = vmax.f32 %v141_v55, 1e-12  ;;  %v134_v2 = vsel %vm132_vm10, %v133_v0, %v131_v56  ;;  %v122_v63 = vmul.f32 %v600_v53, %v867_v50  ;;  %v297_v0 = vpop.xlane.xlu0 %296 }
  0xb8   :  { %v602_v3 = vpop.eup %601  ;;  %288 = vst.msk [vmem:[#allocation2 + $0x60] sm:$0xff] %vm51_vm0, %v272_v54  ;;  %v216_v4 = vmax.f32 %v134_v2, 1e-12  ;;  %vm300_vm4 = vcmp.eq.f32.partialorder %v297_v0, inf  ;;  %vm302_vm5 = vcmp.eq.f32.partialorder %v297_v0, 0.0 }
  0xb9   :  { %v604_v6 = vpop.eup %603  ;;  %v271_v31 = vmul.f32 %v602_v3, %v714_v8  ;;  %619 = vrcp.f32 %v217_v62  ;;  %v124_v36 = vsel %vm123_vm11, %v867_v50, %v122_v63  ;;  %v112_v50 = vand.u32 2147483648, %v894_v10 }
  0xba   :  { %v606_v5 = vpop.eup %605  ;;  %v270_v7 = vmul.f32 %v604_v6, %v719_v9  ;;  %621 = vrcp.f32 %v216_v4  ;;  %v127_v59 = vsel %vm125_vm12, %v126_v57, %v124_v36  ;;  %v324_v14 = vld [vmem:[#allocation2 + $0x78] sm:$0xff] }
  0xbb   :  { %v608_v15 = vpop.eup %607  ;;  %287 = vst.msk [vmem:[#allocation2 + $0x58] sm:$0xff] %vm51_vm0, %v271_v31  ;;  %v215_v18 = vmax.f32 %v127_v59, 1e-12  ;;  %v115_v8 = vmul.f32 %v606_v5, %v887_v58  ;;  %527 = vmatpush3.xpose.msk.msra.mxu0 %vm51_vm0, %v324_v14  ;;  %v322_v44 = vld [vmem:[#allocation2 + $0x68] sm:$0xff]  ;;  %v447_v14 = vlaneseq }
  0xbc   :  { %v610_v19 = vpop.eup %609  ;;  %286 = vst.msk [vmem:[#allocation2 + $0x50] sm:$0xff] %vm51_vm0, %v270_v7  ;;  %v108_v9 = vmul.f32 %v608_v15, %v894_v10  ;;  %528 = vmatprep.subr.mxu0 %v659_v51 }
  0xbd   :  { %v612_v20 = vpop.eup %611  ;;  %v269_v21 = vmul.f32 %v610_v19, %v732_v16  ;;  %623 = vrcp.f32 %v215_v18  ;;  %v117_v24 = vsel %vm116_vm13, %v887_v58, %v115_v8  ;;  %v448_v15 = vand.u32 127, %v447_v14  ;;  %v454_v18 = vpop.permute.xlu1 %453 }
  0xbe   :  { %v614_v25 = vpop.eup %613  ;;  %v268_v26 = vmul.f32 %v612_v20, %v737_v17  ;;  %v120_v27 = vsel %vm118_vm14, %v119_v13, %v117_v24  ;;  %v110_v61 = vsel %vm109_vm15, %v894_v10, %v108_v9  ;;  %v323_v16 = vld [vmem:[#allocation2 + $0x70] sm:$0xff] }
  0xbf   :  { %285 = vst.msk [vmem:[#allocation2 + $0x48] sm:$0xff] %vm51_vm0, %v269_v21  ;;  %v214_v32 = vmax.f32 %v120_v27, 1e-12  ;;  %v113_v33 = vsel %vm111_vm1, %v112_v50, %v110_v61  ;;  %v101_v37 = vmul.f32 %v614_v25, %v909_v60  ;;  %529 = vmatpush3.xpose.msk.msra.mxu0 %vm51_vm0, %v323_v16  ;;  %v321_v45 = vld [vmem:[#allocation2 + $0x60] sm:$0xff]  ;;  %vm455_vm6 = vcmp.eq.s32.totalorder %v448_v15, %v454_v18 }
  0xc0   :  { %v616_v17 = vpop.eup %615  ;;  %284 = vst.msk [vmem:[#allocation2 + $0x40] sm:$0xff] %vm51_vm0, %v268_v26  ;;  %v213_v58 = vmax.f32 %v113_v33, 1e-12  ;;  %530 = vmatprep.subr.mxu0 %v659_v51 }
  0xc1   :  { %v618_v10 = vpop.eup %617  ;;  %v267_v38 = vmul.f32 %v616_v17, %v748_v22  ;;  %625 = vrcp.f32 %v214_v32  ;;  %v103_v39 = vsel %vm102_vm2, %v909_v60, %v101_v37 }
  0xc2   :  { %v266_v42 = vmul.f32 %v618_v10, %v753_v23  ;;  %627 = vrcp.f32 %v213_v58  ;;  %v106_v43 = vsel %vm104_vm3, %v105_v30, %v103_v39  ;;  %v320_v1 = vld [vmem:[#allocation2 + $0x58] sm:$0xff] }
  0xc3   :  { %283 = vst.msk [vmem:[#allocation2 + $0x38] sm:$0xff] %vm51_vm0, %v267_v38  ;;  %v212_v11 = vmax.f32 %v106_v43, 1e-12  ;;  %531 = vmatpush3.xpose.msk.msra.mxu0 %vm51_vm0, %v322_v44  ;;  %v319_v49 = vld [vmem:[#allocation2 + $0x50] sm:$0xff] }
  0xc4   :  { %282 = vst.msk [vmem:[#allocation2 + $0x30] sm:$0xff] %vm51_vm0, %v266_v42  ;;  %532 = vmatprep.subr.mxu0 %v659_v51 }
  0xc5   :  { %629 = vrcp.f32 %v212_v11 }
  0xc6   :  { %v620_v22 = vpop.eup %619  ;;  %631 = vrsqrt.f32 %v297_v0  ;;  %v318_v54 = vld [vmem:[#allocation2 + $0x48] sm:$0xff] }
  0xc7   :  { %v622_v12 = vpop.eup %621  ;;  %v265_v60 = vmul.f32 %v620_v22, %v764_v28  ;;  %533 = vmatpush3.xpose.msk.msra.mxu0 %vm51_vm0, %v321_v45 }
  0xc8   :  { %v264_v23 = vmul.f32 %v622_v12, %v769_v29  ;;  %534 = vmatprep.subr.mxu0 %v659_v51 }
  0xc9   :  { %281 = vst.msk [vmem:[#allocation2 + $0x28] sm:$0xff] %vm51_vm0, %v265_v60 }
  0xca   :  { %v624_v47 = vpop.eup %623  ;;  %280 = vst.msk [vmem:[#allocation2 + $0x20] sm:$0xff] %vm51_vm0, %v264_v23  ;;  %v316_v57 = vld [vmem:[#allocation2 + $0x38] sm:$0xff] }
  0xcb   :  { %v263_v48 = vmul.f32 %v624_v47, %v780_v34  ;;  %535 = vmatpush3.xpose.msk.msra.mxu0 %vm51_vm0, %v320_v1  ;;  %v315_v2 = vld [vmem:[#allocation2 + $0x30] sm:$0xff] }
  0xcc   :  { %536 = vmatprep.subr.mxu0 %v659_v51 }
  0xcd   :  { %279 = vst.msk [vmem:[#allocation2 + $0x18] sm:$0xff] %vm51_vm0, %v263_v48 }
  0xce   :  { %v626_v28 = vpop.eup %625 }
  0xcf   :  { %v628_v29 = vpop.eup %627  ;;  %v262_v52 = vmul.f32 %v626_v28, %v785_v35  ;;  %537 = vmatpush3.xpose.msk.msra.mxu0 %vm51_vm0, %v319_v49  ;;  %v317_v35 = vld [vmem:[#allocation2 + $0x40] sm:$0xff] }
  0xd0   :  { %v261_v53 = vmul.f32 %v628_v29, %v796_v40  ;;  %538 = vmatprep.subr.mxu0 %v659_v51  ;;  %v314_v3 = vld [vmem:[#allocation2 + $0x28] sm:$0xff] }
  0xd1   :  { %278 = vst.msk [vmem:[#allocation2 + $0x10] sm:$0xff] %vm51_vm0, %v262_v52  ;;  %v313_v6 = vld [vmem:[#allocation2 + $0x20] sm:$0xff] }
  0xd2   :  { %v630_v34 = vpop.eup %629  ;;  %277 = vst.msk [vmem:[#allocation2 + $0x8] sm:$0xff] %vm51_vm0, %v261_v53 }
  0xd3   :  { %v260_v55 = vmul.f32 %v630_v34, %v801_v41  ;;  %539 = vmatpush3.xpose.msk.msra.mxu0 %vm51_vm0, %v318_v54  ;;  %v632_v56 = vpop.eup %631  ;;  %v303_v41 = vand.u32 2147483648, %v297_v0 }
  0xd4   :  { %540 = vmatprep.subr.mxu0 %v659_v51  ;;  %v299_v40 = vmul.f32 %v632_v56, %v297_v0  ;;  %v312_v31 = vld [vmem:[#allocation2 + $0x18] sm:$0xff] }
  0xd5   :  { %276 = vst.msk [vmem:[#allocation2] sm:$0xff] %vm51_vm0, %v260_v55 }
  0xd6   :  { %v301_v62 = vsel %vm300_vm4, %v297_v0, %v299_v40 }
  0xd7   :  { %541 = vmatpush3.xpose.msk.msra.mxu0 %vm51_vm0, %v317_v35  ;;  %v304_v63 = vsel %vm302_vm5, %v303_v41, %v301_v62 }
  0xd8   :  { %542 = vmatprep.subr.mxu0 %v659_v51  ;;  %v305_v4 = vmax.f32 %v304_v63, 1e-12  ;;  %v311_v36 = vld [vmem:[#allocation2 + $0x10] sm:$0xff] }
  0xd9   :  { %v310_v5 = vld [vmem:[#allocation2 + $0x8] sm:$0xff] }
  0xda   :  { %633 = vrcp.f32 %v305_v4 }
  0xdb   :  { %543 = vmatpush3.xpose.msk.msra.mxu0 %vm51_vm0, %v316_v57 }
  0xdc   :  { %544 = vmatprep.subr.mxu0 %v659_v51  ;;  %v309_v59 = vld [vmem:[#allocation2] sm:$0xff] }
  0xdf   :  { %545 = vmatpush3.xpose.msk.msra.mxu0 %vm51_vm0, %v315_v2 }
  0xe0   :  { %546 = vmatprep.subr.mxu0 %v659_v51 }
  0xe3   :  { %547 = vmatpush3.xpose.msk.msra.mxu0 %vm51_vm0, %v314_v3 }
  0xe4   :  { %548 = vmatprep.subr.mxu0 %v659_v51 }
  0xe7   :  { %549 = vmatpush3.xpose.msk.msra.mxu0 %vm51_vm0, %v313_v6  ;;  %v634_v7 = vpop.eup %633 }
  0xe8   :  { %550 = vmatprep.subr.mxu0 %v659_v51  ;;  %v308_v13 = vmul.f32 %v634_v7, %v812_v46 }
  0xeb   :  { %551 = vmatpush3.xpose.msk.msra.mxu0 %vm51_vm0, %v312_v31 }
  0xec   :  { %552 = vmatprep.subr.mxu0 %v659_v51 }
  0xef   :  { %553 = vmatpush3.xpose.msk.msra.mxu0 %vm51_vm0, %v311_v36 }
  0xf0   :  { %554 = vmatprep.subr.mxu0 %v659_v51 }
  0xf3   :  { %555 = vmatpush3.xpose.msk.msra.mxu0 %vm51_vm0, %v310_v5 }
  0xf4   :  { %556 = vmatprep.subr.mxu0 %v659_v51 }
  0xf7   :  { %557 = vmatpush3.xpose.msk.msra.mxu0 %vm51_vm0, %v309_v59 }
  0xfa   :  { %559 = vmatmul.mubr.msk.f32.vlgmr.msra.gmra.mxu0 %vm51_vm0, %v308_v13 }
 0x1ba   :  { %v442_v8 = vpop.f32.mrf.mxu0 }
 0x1bb   :  { %v456_v50 = vsel %vm455_vm6, %v442_v8, 0.0 }
 0x1bc   :  { %v560_v19 = vpop.f32.mrf.mxu0  ;;  %457 = vadd.xlane.f32.xlu0 %v456_v50 }
 0x245   :  { %v458_v9 = vpop.xlane.xlu0 %457 }
 0x246   :  { %v508_v20 = vclamps-f32 %v458_v9, 1.0 }
 0x248   :  { %v461_v51 = vmul.f32 %v508_v20, %v508_v20  ;;  %v471_v30 = vmul.f32 0.87758255, %v508_v20 }
 0x24a   :  { %v462_v21 = vsub.f32 1.0, %v461_v51 }
 0x24c   :  { %v463_v24 = vmax.f32 %v462_v21, 0.0 }
 0x24e   :  { %635 = vrsqrt.f32 %v463_v24  ;;  %vm466_vm7 = vcmp.eq.f32.partialorder %v463_v24, inf  ;;  %v469_v46 = vand.u32 2147483648, %v463_v24  ;;  %vm468_vm0 = vcmp.eq.f32.partialorder %v463_v24, 0.0 }
 0x25b   :  { %v636_v25 = vpop.eup %635 }
 0x25c   :  { %v465_v26 = vmul.f32 %v636_v25, %v463_v24 }
 0x25e   :  { %v467_v27 = vsel %vm466_vm7, %v463_v24, %v465_v26 }
 0x25f   :  { %v470_v61 = vsel %vm468_vm0, %v469_v46, %v467_v27 }
 0x260   :  { %v472_v16 = vmul.f32 0.47942555, %v470_v61 }
 0x262   :  { %v473_v32 = vsub.f32 %v471_v30, %v472_v16 }
 0x264   :  { %v474_v33 = vsel %vm455_vm6, %v473_v32, %v442_v8 }
 0x265   :  { %v475_v37 = vmul.f32 30.0, %v474_v33 }
 0x267   :  { %476 = vst [vmem:[#allocation3] sm:$0xff] %v475_v37 }
 0x268   :  { %648 = shalt.err (!%p645_p4)
}
 0x269   :  { %486 = dma.vmem_to_hbm [thread:$0]  %s484_s19, 128, %s1037_s3, [#allocation4]  }
 0x26a   :  { %657 = dma.done.wait [#allocation4], 128  }
 0x26b   :  { %658 = vsyncadd [#allocation4], 4294967168 }
 0x26c   :  { %490 = vsyncpa [#allocation4], 1 }

</bundles_post_ra>
